<compile_context>
chip_gen: v7x
topology: tpu7x:2x2x1
jax: 0.10.0
libtpu: 0.0.40
codegen_flags: <defaults>
</compile_context>

<pallas_src>
import functools

import jax
import jax.numpy as jnp
from jax.experimental import pallas as pl
from jax.experimental.pallas import tpu as pltpu


def _round_up(x, m):
    return (x + m - 1) // m * m


def _pad2(a, rows, cols):
    r, c = a.shape
    return jnp.pad(a, ((0, rows - r), (0, cols - c)))


def _choose_tn(V, Hp, w_bytes=1, target_tile_bytes=2 << 20, max_pad_frac=0.02):
    """Vocab-tile width from a byte budget (lane-dense, low padding waste)."""
    vp128 = _round_up(V, 128)
    tn = _round_up(max(128, target_tile_bytes // max(Hp * w_bytes, 1)), 128)
    tn = min(tn, vp128)
    # Shrink until padded-vocab waste is acceptable (or we hit the 128 floor).
    while tn > 128 and (_round_up(V, tn) - V) > max_pad_frac * V:
        tn -= 128
    return tn


# ---------------------------------------------------------------------------
# Kernel 1: GRU cell (single step, un-gridded, everything fits in VMEM)
# ---------------------------------------------------------------------------
def _gru_cell_kernel(x_ref, h_ref, wih_ref, whh_ref, bih_ref, bhh_ref,
                     hf32_ref, hbf16_ref):
    Hp = h_ref.shape[1]
    x = x_ref[...]                                   # (Bp, Ep) bf16
    h = h_ref[...]                                   # (Bp, Hp) f32
    gi = jnp.dot(x, wih_ref[...],
                 preferred_element_type=jnp.float32) + bih_ref[...]
    gh = jnp.dot(h.astype(jnp.bfloat16), whh_ref[...],
                 preferred_element_type=jnp.float32) + bhh_ref[...]
    # Gate order r | z | n; each gate block padded to Hp -> 128-aligned slices.
    r = jax.nn.sigmoid(gi[:, 0:Hp] + gh[:, 0:Hp])
    z = jax.nn.sigmoid(gi[:, Hp:2 * Hp] + gh[:, Hp:2 * Hp])
    n = jnp.tanh(gi[:, 2 * Hp:3 * Hp] + r * gh[:, 2 * Hp:3 * Hp])
    h_new = (1.0 - z) * n + z * h                    # (Bp, Hp) f32
    hf32_ref[...] = h_new
    hbf16_ref[...] = h_new.astype(jnp.bfloat16)


# ---------------------------------------------------------------------------
# Kernel 2: vocab-tiled output projection (HBM-bound stream over int8 W_out)
# ---------------------------------------------------------------------------
def _vocab_proj_kernel(h_ref, wq_ref, scale_ref, bout_ref, pred_ref):
    # Dequant int8 -> bf16 (values in [-127,127] are exact in bf16); the VPU
    # has slack here since the kernel is bound by the W_out DMA.
    w = wq_ref[...].astype(jnp.float32).astype(jnp.bfloat16)     # (Hp, tn)
    acc = jnp.dot(h_ref[...], w, preferred_element_type=jnp.float32)
    pred_ref[...] = (acc * scale_ref[...] + bout_ref[...]).astype(pred_ref.dtype)


# ---------------------------------------------------------------------------
# Host-side wrappers
# ---------------------------------------------------------------------------
def prepare_params(params, tn=None, target_tile_bytes=2 << 20):
    """Pad params to hardware-friendly shapes; bf16 GRU weights, int8 W_out.

    Gate layout stays r|z|n, but each gate block is padded from H to Hp so the
    in-kernel gate slices are 128-lane aligned.  W_out is quantized per column
    (symmetric int8, f32 scales) to halve the dominant HBM stream.
    """
    emb = params["embedding"]
    V, E = emb.shape
    H = params["w_hh"].shape[0]
    Ep = _round_up(E, 128)
    Hp = _round_up(H, 128)
    if tn is None:
        tn = _choose_tn(V, Hp, w_bytes=1, target_tile_bytes=target_tile_bytes)
    Vp = _round_up(V, tn)

    def pad_gates(w, rows_p):
        r, z, n = jnp.split(w, 3, axis=1)                # each (rows, H)
        return jnp.concatenate([_pad2(g, rows_p, Hp) for g in (r, z, n)], axis=1)

    # Per-column symmetric int8 quantization of W_out.
    w_out = _pad2(params["w_out"], Hp, Vp)                          # (Hp, Vp) f32
    absmax = jnp.max(jnp.abs(w_out), axis=0, keepdims=True)         # (1, Vp)
    w_scale = (jnp.maximum(absmax, 1e-8) / 127.0).astype(jnp.float32)
    w_out_q = jnp.clip(jnp.round(w_out / w_scale), -127, 127).astype(jnp.int8)

    prepped = {
        "embedding": _pad2(emb, V, Ep).astype(jnp.bfloat16),            # (V, Ep)
        "w_ih": pad_gates(params["w_ih"], Ep).astype(jnp.bfloat16),     # (Ep, 3Hp)
        "w_hh": pad_gates(params["w_hh"], Hp).astype(jnp.bfloat16),     # (Hp, 3Hp)
        "b_ih": pad_gates(params["b_ih"], 1).astype(jnp.float32),       # (1, 3Hp)
        "b_hh": pad_gates(params["b_hh"], 1).astype(jnp.float32),       # (1, 3Hp)
        "w_out_q": w_out_q,                                             # (Hp, Vp) int8
        "w_out_scale": w_scale,                                         # (1, Vp) f32
        "b_out": _pad2(params["b_out"], 1, Vp).astype(jnp.float32),     # (1, Vp)
    }
    return prepped, tn


@functools.partial(jax.jit, static_argnames=("tn", "hidden_dim", "vocab_size"))
def decoder_forward(sent, h_prev, prepped, *, tn, hidden_dim, vocab_size):
    """sent: (B,) int32 token ids.  h_prev: (B, H) float32.
    Returns (predict (B, V), hidden (B, H), sent (B, 1)) matching PyTorch."""
    B = sent.shape[0]
    H, V = hidden_dim, vocab_size
    Ep = prepped["w_ih"].shape[0]
    Hp = prepped["w_hh"].shape[0]
    Vp = prepped["w_out_q"].shape[1]
    Bp = _round_up(max(B, 8), 8)
    n_tiles = Vp // tn

    sent_2d = sent[:, None]                                 # == sent.unsqueeze(1)

    # Embedding gather stays in XLA (B*Ep*2 bytes; fusing it is not worth it).
    x_emb = jnp.take(prepped["embedding"], sent, axis=0)    # (B, Ep) bf16
    x_emb = jnp.pad(x_emb, ((0, Bp - B), (0, 0)))           # (Bp, Ep)
    h_pad = _pad2(h_prev.astype(jnp.float32), Bp, Hp)       # (Bp, Hp)

    # ---- Kernel 1: GRU cell -------------------------------------------------
    gru_bytes = (x_emb.size * 2 + h_pad.size * 4
                 + prepped["w_ih"].size * 2 + prepped["w_hh"].size * 2
                 + prepped["b_ih"].size * 4 + prepped["b_hh"].size * 4
                 + Bp * Hp * (4 + 2))
    h_new_f32, h_new_bf16 = pl.pallas_call(
        _gru_cell_kernel,
        out_shape=(
            jax.ShapeDtypeStruct((Bp, Hp), jnp.float32),
            jax.ShapeDtypeStruct((Bp, Hp), jnp.bfloat16),
        ),
        compiler_params=pltpu.CompilerParams(
            vmem_limit_bytes=min(int(gru_bytes * 2) + (1 << 20), 96 << 20)),
        cost_estimate=pl.CostEstimate(
            flops=2 * Bp * (Ep + Hp) * 3 * Hp,
            transcendentals=3 * Bp * Hp,
            bytes_accessed=gru_bytes),
    )(x_emb, h_pad, prepped["w_ih"], prepped["w_hh"],
      prepped["b_ih"], prepped["b_hh"])

    # ---- Kernel 2: vocab-tiled projection -----------------------------------
    tile_bytes = Hp * tn * 1 + 2 * tn * 4 + Bp * tn * 4     # W_out + scale/bias + pred
    proj_vmem = 2 * tile_bytes + 2 * Bp * Hp * 2            # double-buffered + resident h
    proj_bytes = Hp * Vp * 1 + Vp * 4 * 2 + Bp * Hp * 2 + Bp * Vp * 4

    pred_p = pl.pallas_call(
        _vocab_proj_kernel,
        out_shape=jax.ShapeDtypeStruct((Bp, Vp), jnp.float32),
        grid=(n_tiles,),
        in_specs=[
            pl.BlockSpec((Bp, Hp), lambda j: (0, 0)),        # h_new bf16 (resident)
            pl.BlockSpec((Hp, tn), lambda j: (0, j)),        # W_out int8 (tiled over V)
            pl.BlockSpec((1, tn), lambda j: (0, j)),         # per-column scale
            pl.BlockSpec((1, tn), lambda j: (0, j)),         # bias
        ],
        out_specs=pl.BlockSpec((Bp, tn), lambda j: (0, j)),  # predict (tiled over V)
        compiler_params=pltpu.CompilerParams(
            dimension_semantics=("parallel",),               # no cross-tile state
            vmem_limit_bytes=min(max(4 * proj_vmem, 4 << 20), 48 << 20)),
        cost_estimate=pl.CostEstimate(
            flops=2 * Bp * Hp * Vp, transcendentals=0,
            bytes_accessed=proj_bytes),
    )(h_new_bf16, prepped["w_out_q"], prepped["w_out_scale"], prepped["b_out"])

    predict = pred_p[:B, :V]
    hidden = h_new_f32[:B, :H]
    return predict, hidden, sent_2d


# ---------------------------------------------------------------------------
# Param construction + pure-JAX reference (mirrors the kernel numerics:
# bf16 GRU weights, int8 per-column-quantized W_out, f32 accumulate)
# ---------------------------------------------------------------------------
def make_params(key, vocab_size, emb_dim, hidden_dim):
    ks = jax.random.split(key, 7)
    scale = 0.1
    return {
        # nn.Embedding(dictionary_size, embedding_dimension) from weight_matrix
        "embedding": scale * jax.random.normal(ks[0], (vocab_size, emb_dim), jnp.float32),
        # GRU weight_ih_l0 is (3H, E) in torch; stored pre-transposed (E, 3H)
        "w_ih": scale * jax.random.normal(ks[1], (emb_dim, 3 * hidden_dim), jnp.float32),
        # GRU weight_hh_l0 is (3H, H) in torch; stored pre-transposed (H, 3H)
        "w_hh": scale * jax.random.normal(ks[2], (hidden_dim, 3 * hidden_dim), jnp.float32),
        "b_ih": scale * jax.random.normal(ks[3], (1, 3 * hidden_dim), jnp.float32),
        "b_hh": scale * jax.random.normal(ks[4], (1, 3 * hidden_dim), jnp.float32),
        # nn.Linear(hidden_dim, vocab_size) weight is (V, H); stored pre-transposed (H, V)
        "w_out": scale * jax.random.normal(ks[5], (hidden_dim, vocab_size), jnp.float32),
        "b_out": scale * jax.random.normal(ks[6], (1, vocab_size), jnp.float32),
    }


def _reference_forward(sent, h_prev, params):
    """Pure-JAX reference with the same reduced-precision numerics."""
    H = h_prev.shape[1]
    x = jnp.take(params["embedding"].astype(jnp.bfloat16), sent, axis=0)
    w_ih = params["w_ih"].astype(jnp.bfloat16)
    w_hh = params["w_hh"].astype(jnp.bfloat16)
    gi = jnp.dot(x, w_ih, preferred_element_type=jnp.float32) + params["b_ih"]
    gh = jnp.dot(h_prev.astype(jnp.bfloat16), w_hh,
                 preferred_element_type=jnp.float32) + params["b_hh"]
    r = jax.nn.sigmoid(gi[:, :H] + gh[:, :H])
    z = jax.nn.sigmoid(gi[:, H:2 * H] + gh[:, H:2 * H])
    n = jnp.tanh(gi[:, 2 * H:] + r * gh[:, 2 * H:])
    h_new = (1.0 - z) * n + z * h_prev
    # int8 per-column quantized projection (mirrors the kernel)
    w = params["w_out"]
    absmax = jnp.max(jnp.abs(w), axis=0, keepdims=True)
    scale = jnp.maximum(absmax, 1e-8) / 127.0
    w_q = jnp.clip(jnp.round(w / scale), -127, 127)
    pred = jnp.dot(h_new.astype(jnp.bfloat16), w_q.astype(jnp.bfloat16),
                   preferred_element_type=jnp.float32) * scale + params["b_out"]
    return pred, h_new


if __name__ == "__main__":
    key = jax.random.PRNGKey(0)
    k_param, k_sent, k_hidden = jax.random.split(key, 3)

    batch = 4
    emb_dim = 32
    hidden_dim = 32
    vocab_size = 500     # pads to 512 -> several 128-wide vocab tiles (exercises grid)

    params = make_params(k_param, vocab_size, emb_dim, hidden_dim)
    prepped, tn = prepare_params(params)

    sent = jax.random.randint(k_sent, (batch,), 0, vocab_size, dtype=jnp.int32)
    h_prev = jax.random.normal(k_hidden, (batch, hidden_dim), jnp.float32)

    predict, hidden, sent_out = decoder_forward(
        sent, h_prev, prepped, tn=tn, hidden_dim=hidden_dim, vocab_size=vocab_size)
    jax.block_until_ready((predict, hidden, sent_out))

    # sanity check against pure-JAX reference
    ref_pred, ref_hidden = _reference_forward(sent, h_prev, params)
    assert predict.shape == (batch, vocab_size)
    assert hidden.shape == (batch, hidden_dim)
    assert sent_out.shape == (batch, 1)
    assert jnp.allclose(predict, ref_pred, atol=2e-3, rtol=2e-3)
    assert jnp.allclose(hidden, ref_hidden, atol=2e-3, rtol=2e-3)

    print("KERNEL_OK")
</pallas_src>

<mosaic_0001>
module attributes {stable_mosaic.version = 11 : i64} {
  func.func @_gru_cell_kernel(%arg0: memref<8x128xbf16, #tpu.memory_space<vmem>>, %arg1: memref<8x128xf32, #tpu.memory_space<vmem>>, %arg2: memref<128x384xbf16, #tpu.memory_space<vmem>>, %arg3: memref<128x384xbf16, #tpu.memory_space<vmem>>, %arg4: memref<1x384xf32, #tpu.memory_space<vmem>>, %arg5: memref<1x384xf32, #tpu.memory_space<vmem>>, %arg6: memref<8x128xf32, #tpu.memory_space<vmem>>, %arg7: memref<8x128xbf16, #tpu.memory_space<vmem>>) attributes {dimension_semantics = [], scalar_prefetch = 0 : i64, scratch_operands = 0 : i64, tpu.core_type = #tpu.core_type<tc>} {
    %c0 = arith.constant 0 : index
    %c0_0 = arith.constant 0 : index
    %0 = vector.load %arg0[%c0, %c0_0] : memref<8x128xbf16, #tpu.memory_space<vmem>>, vector<8x128xbf16>
    %c0_1 = arith.constant 0 : index
    %c0_2 = arith.constant 0 : index
    %1 = vector.load %arg1[%c0_1, %c0_2] : memref<8x128xf32, #tpu.memory_space<vmem>>, vector<8x128xf32>
    %c0_3 = arith.constant 0 : index
    %c0_4 = arith.constant 0 : index
    %2 = vector.load %arg2[%c0_3, %c0_4] : memref<128x384xbf16, #tpu.memory_space<vmem>>, vector<128x384xbf16>
    %cst = arith.constant dense<0.000000e+00> : vector<8x384xf32>
    %3 = tpu.matmul %0, %2, %cst {dimension_numbers = #tpu.dot_dimension_numbers<[1], [0], [0], [1], [0, 0, 1, 1], [], []>} : vector<8x128xbf16>, vector<128x384xbf16>, vector<8x384xf32> -> vector<8x384xf32>
    %c0_5 = arith.constant 0 : index
    %c0_6 = arith.constant 0 : index
    %4 = vector.load %arg4[%c0_5, %c0_6] : memref<1x384xf32, #tpu.memory_space<vmem>>, vector<1x384xf32>
    %5 = vector.broadcast %4 : vector<1x384xf32> to vector<8x384xf32>
    %6 = arith.addf %3, %5 : vector<8x384xf32>
    %7 = arith.truncf %1 : vector<8x128xf32> to vector<8x128xbf16>
    %c0_7 = arith.constant 0 : index
    %c0_8 = arith.constant 0 : index
    %8 = vector.load %arg3[%c0_7, %c0_8] : memref<128x384xbf16, #tpu.memory_space<vmem>>, vector<128x384xbf16>
    %cst_9 = arith.constant dense<0.000000e+00> : vector<8x384xf32>
    %9 = tpu.matmul %7, %8, %cst_9 {dimension_numbers = #tpu.dot_dimension_numbers<[1], [0], [0], [1], [0, 0, 1, 1], [], []>} : vector<8x128xbf16>, vector<128x384xbf16>, vector<8x384xf32> -> vector<8x384xf32>
    %c0_10 = arith.constant 0 : index
    %c0_11 = arith.constant 0 : index
    %10 = vector.load %arg5[%c0_10, %c0_11] : memref<1x384xf32, #tpu.memory_space<vmem>>, vector<1x384xf32>
    %11 = vector.broadcast %10 : vector<1x384xf32> to vector<8x384xf32>
    %12 = arith.addf %9, %11 : vector<8x384xf32>
    %13 = vector.extract_strided_slice %6 {offsets = [0, 0], sizes = [8, 128], strides = [1, 1]} : vector<8x384xf32> to vector<8x128xf32>
    %14 = vector.extract_strided_slice %12 {offsets = [0, 0], sizes = [8, 128], strides = [1, 1]} : vector<8x384xf32> to vector<8x128xf32>
    %15 = arith.addf %13, %14 : vector<8x128xf32>
    %16 = arith.negf %15 : vector<8x128xf32>
    %17 = math.exp %16 : vector<8x128xf32>
    %cst_12 = arith.constant 1.000000e+00 : f32
    %18 = vector.broadcast %cst_12 : f32 to vector<8x128xf32>
    %19 = arith.addf %18, %17 : vector<8x128xf32>
    %20 = arith.divf %18, %19 : vector<8x128xf32>
    %21 = vector.extract_strided_slice %6 {offsets = [0, 128], sizes = [8, 128], strides = [1, 1]} : vector<8x384xf32> to vector<8x128xf32>
    %22 = vector.extract_strided_slice %12 {offsets = [0, 128], sizes = [8, 128], strides = [1, 1]} : vector<8x384xf32> to vector<8x128xf32>
    %23 = arith.addf %21, %22 : vector<8x128xf32>
    %24 = arith.negf %23 : vector<8x128xf32>
    %25 = math.exp %24 : vector<8x128xf32>
    %cst_13 = arith.constant 1.000000e+00 : f32
    %26 = vector.broadcast %cst_13 : f32 to vector<8x128xf32>
    %27 = arith.addf %26, %25 : vector<8x128xf32>
    %28 = arith.divf %26, %27 : vector<8x128xf32>
    %29 = vector.extract_strided_slice %6 {offsets = [0, 256], sizes = [8, 128], strides = [1, 1]} : vector<8x384xf32> to vector<8x128xf32>
    %30 = vector.extract_strided_slice %12 {offsets = [0, 256], sizes = [8, 128], strides = [1, 1]} : vector<8x384xf32> to vector<8x128xf32>
    %31 = arith.mulf %20, %30 : vector<8x128xf32>
    %32 = arith.addf %29, %31 : vector<8x128xf32>
    %33 = math.tanh %32 : vector<8x128xf32>
    %cst_14 = arith.constant 1.000000e+00 : f32
    %34 = vector.broadcast %cst_14 : f32 to vector<8x128xf32>
    %35 = arith.subf %34, %28 : vector<8x128xf32>
    %36 = arith.mulf %35, %33 : vector<8x128xf32>
    %37 = arith.mulf %28, %1 : vector<8x128xf32>
    %38 = arith.addf %36, %37 : vector<8x128xf32>
    %c0_15 = arith.constant 0 : index
    %c0_16 = arith.constant 0 : index
    %39 = vector.load %arg6[%c0_15, %c0_16] : memref<8x128xf32, #tpu.memory_space<vmem>>, vector<8x128xf32>
    tpu.vector_store %arg6[%c0_15, %c0_16], %38 {strides = array<i32>} : memref<8x128xf32, #tpu.memory_space<vmem>>, vector<8x128xf32>,
    %40 = arith.truncf %38 : vector<8x128xf32> to vector<8x128xbf16>
    %c0_17 = arith.constant 0 : index
    %c0_18 = arith.constant 0 : index
    %41 = vector.load %arg7[%c0_17, %c0_18] : memref<8x128xbf16, #tpu.memory_space<vmem>>, vector<8x128xbf16>
    tpu.vector_store %arg7[%c0_17, %c0_18], %40 {strides = array<i32>} : memref<8x128xbf16, #tpu.memory_space<vmem>>, vector<8x128xbf16>,
    return
  }
}

module attributes {stable_mosaic.version = 11 : i64} {
  func.func @_vocab_proj_kernel(%arg0: i32, %arg1: memref<8x128xbf16, #tpu.memory_space<vmem>>, %arg2: memref<128x128xi8, #tpu.memory_space<vmem>>, %arg3: memref<1x128xf32, #tpu.memory_space<vmem>>, %arg4: memref<1x128xf32, #tpu.memory_space<vmem>>, %arg5: memref<8x128xf32, #tpu.memory_space<vmem>>) attributes {dimension_semantics = [#tpu.dimension_semantics<parallel>], iteration_bounds = array<i64: 4>, scalar_prefetch = 0 : i64, scratch_operands = 0 : i64, tpu.core_type = #tpu.core_type<tc>, window_params = [{pipeline_mode = #tpu.pipeline_mode<synchronous>, transform_indices = @transform_0, window_bounds = array<i64: 8, 128>}, {transform_indices = @transform_1, window_bounds = array<i64: 128, 128>}, {transform_indices = @transform_2, window_bounds = array<i64: 1, 128>}, {transform_indices = @transform_3, window_bounds = array<i64: 1, 128>}, {transform_indices = @transform_4, window_bounds = array<i64: 8, 128>}]} {
    %c0 = arith.constant 0 : index
    %c0_0 = arith.constant 0 : index
    %0 = vector.load %arg2[%c0, %c0_0] : memref<128x128xi8, #tpu.memory_space<vmem>>, vector<128x128xi8>
    %1 = arith.sitofp %0 : vector<128x128xi8> to vector<128x128xf32>
    %2 = arith.truncf %1 : vector<128x128xf32> to vector<128x128xbf16>
    %c0_1 = arith.constant 0 : index
    %c0_2 = arith.constant 0 : index
    %3 = vector.load %arg1[%c0_1, %c0_2] : memref<8x128xbf16, #tpu.memory_space<vmem>>, vector<8x128xbf16>
    %cst = arith.constant dense<0.000000e+00> : vector<8x128xf32>
    %4 = tpu.matmul %3, %2, %cst {dimension_numbers = #tpu.dot_dimension_numbers<[1], [0], [0], [1], [0, 0, 1, 1], [], []>} : vector<8x128xbf16>, vector<128x128xbf16>, vector<8x128xf32> -> vector<8x128xf32>
    %c0_3 = arith.constant 0 : index
    %c0_4 = arith.constant 0 : index
    %5 = vector.load %arg3[%c0_3, %c0_4] : memref<1x128xf32, #tpu.memory_space<vmem>>, vector<1x128xf32>
    %6 = vector.broadcast %5 : vector<1x128xf32> to vector<8x128xf32>
    %7 = arith.mulf %4, %6 : vector<8x128xf32>
    %c0_5 = arith.constant 0 : index
    %c0_6 = arith.constant 0 : index
    %8 = vector.load %arg4[%c0_5, %c0_6] : memref<1x128xf32, #tpu.memory_space<vmem>>, vector<1x128xf32>
    %9 = vector.broadcast %8 : vector<1x128xf32> to vector<8x128xf32>
    %10 = arith.addf %7, %9 : vector<8x128xf32>
    %c0_7 = arith.constant 0 : index
    %c0_8 = arith.constant 0 : index
    %11 = vector.load %arg5[%c0_7, %c0_8] : memref<8x128xf32, #tpu.memory_space<vmem>>, vector<8x128xf32>
    tpu.vector_store %arg5[%c0_7, %c0_8], %10 {strides = array<i32>} : memref<8x128xf32, #tpu.memory_space<vmem>>, vector<8x128xf32>,
    return
  }
  func.func @transform_0(%arg0: i32) -> (i32, i32) {
    %c0_i32 = arith.constant 0 : i32
    %c0_i32_0 = arith.constant 0 : i32
    %c0_i32_1 = arith.constant 0 : i32
    return %c0_i32, %c0_i32_0 : i32, i32
  }
  func.func @transform_1(%arg0: i32) -> (i32, i32) {
    %c0_i32 = arith.constant 0 : i32
    %c0_i32_0 = arith.constant 0 : i32
    return %c0_i32, %arg0 : i32, i32
  }
  func.func @transform_2(%arg0: i32) -> (i32, i32) {
    %c0_i32 = arith.constant 0 : i32
    %c0_i32_0 = arith.constant 0 : i32
    return %c0_i32, %arg0 : i32, i32
  }
  func.func @transform_3(%arg0: i32) -> (i32, i32) {
    %c0_i32 = arith.constant 0 : i32
    %c0_i32_0 = arith.constant 0 : i32
    return %c0_i32, %arg0 : i32, i32
  }
  func.func @transform_4(%arg0: i32) -> (i32, i32) {
    %c0_i32 = arith.constant 0 : i32
    %c0_i32_0 = arith.constant 0 : i32
    return %c0_i32, %arg0 : i32, i32
  }
}

</mosaic_0001>

<bundles_post_ra>
// kernel: decoder_forward.3
= control target key start
LH: loop header
LB: loop body
LE: loop exit
PB: predicated region body
PF: predicated region fallthrough
CT: control target
= control target key end

     0   :  { %s537_s15 = smov 0   ;;  %s539_s16 = smov 0   ;;  %s600_s0 = inlined_call_operand.vmem [shape: bf16[8,128], index: 0, kind: input, shape index: {}]   ;;  %s601_s1 = inlined_call_operand.vmem [shape: s8[128,512], index: 1, kind: input, shape index: {}]   ;;  %s602_s2 = inlined_call_operand.vmem [shape: f32[1,512], index: 2, kind: input, shape index: {}]   ;;  %s603_s3 = inlined_call_operand.vmem [shape: f32[1,512], index: 3, kind: input, shape index: {}]   ;;  %s604_s4 = inlined_call_operand.vmem [shape: f32[8,512], index: 4, kind: output, shape index: {}]  }
   0x1   :  { %s541_s17 = smov 0  }
   0x2 LB: > { %s418_s18 = sadd.s32 4294967295, %s508_s17   ;;  %s554_s19 = sadd.s32 1, %s508_s17   ;;  %s508_s17 = sphi %s541_s17, %s607_s17   ;;  %s504_s16 = sphi %s539_s16, %s606_s16   ;;  %s500_s15 = sphi %s537_s15, %s605_s15  }
   0x3   : > { %s39_s20 = ssub.s32 %s508_s17, %s554_s19  ;;  %s42_s21 = sadd.s32 1, %s504_s16 }
   0x4   : > { %p40_p0 = scmp.eq.s32.totalorder %s39_s20, 0  ;;  %p49_p1 = scmp.ne.s32.totalorder %s504_s16, %s500_s15 }
   0x5   : > { %p50_p2 = scmp.eq.s32.totalorder %s508_s17, 0  ;;  %p421_p4 = scmp.ge.s32.totalorder %s508_s17, 4 }
   0x6   : > { %s563_s22 = scalar_select %p40_p0, %s504_s16, %s42_s21  }
   0x7   : > { %p51_p3 = por %p50_p2, %p49_p1  ;;  %156 = sbr.rel (%p421_p4) target bundleno = 22 (0x16), region = 20 }
   0xe   : > { %159 = sbr.rel (!%p51_p3) target bundleno = 22 (0x16), region = 24  ;;  %s161_s23 = sand.u32 (%p51_p3), 1, %s504_s16  }
   0xf   : > { %s423_s24 = sshll.u32 (%p51_p3), %s508_s17, 3  ;;  %s422_s25 = sshll.u32 (%p51_p3), %s161_s23, 5 }
  0x10   : > { %s165_s28 = scalar_lea.vmem (%p51_p3), %s601_s1, %s423_s24  ;;  %s163_s29 = scalar_lea.vmem (%p51_p3), [#allocation2], %s422_s25 }
  0x11   : > { %v199_v0 = vld [vmem:[%s165_s28] sm:$0xff] (%p51_p3) }
  0x12   : > { %v201_v1 = vld [vmem:[%s165_s28 + $0x20] sm:$0xff] (%p51_p3)  ;;  %200 = vst [vmem:[%s163_s29] sm:$0xff] (%p51_p3), %v199_v0 }
  0x13   : > { %v203_v2 = vld [vmem:[%s165_s28 + $0x40] sm:$0xff] (%p51_p3)  ;;  %202 = vst [vmem:[%s163_s29 + $0x8] sm:$0xff] (%p51_p3), %v201_v1 }
  0x14   : > { %204 = vst [vmem:[%s163_s29 + $0x10] sm:$0xff] (%p51_p3), %v203_v2  ;;  %v205_v3 = vld [vmem:[%s165_s28 + $0x60] sm:$0xff] (%p51_p3) }
  0x15   : > { %206 = vst [vmem:[%s163_s29 + $0x18] sm:$0xff] %v205_v3 }
  0x16 PF: > { %p424_p5 = scmp.ge.s32.totalorder %s508_s17, 1  ;;  %p223_p6 = scmp.lt.s32.totalorder %s508_s17, 5 }
  0x18   : > { %p224_p7 = pnand %p424_p5, %p223_p6 }
  0x19   : > { %s230_s30 = sand.u32 (!%p224_p7), 1, %s500_s15   ;;  %v510_v4 = vmov (!%p224_p7), 0.0   ;;  %vm511_vm0 = vmmov (!%p224_p7), 0   ;;  %v283_v17 = vld [vmem:[%s600_s0] sm:$0xf] (!%p224_p7)  ;;  %p260_p8 = scmp.lt.s32.totalorder (!%p224_p7), %s418_s18, 3 }
  0x1a   : > { %227 = sbr.rel (%p224_p7) target bundleno = 279 (0x117), region = 70  ;;  %440 = vmatprep.subr.bf16.mxu0 (!%p224_p7), %v510_v4  ;;  %s425_s5 = sshll.u32 (!%p224_p7), %s230_s30, 5  ;;  %456 = vmatprep.mubr.msk.bf16.mxu0 (!%p224_p7), %vm511_vm0, %v510_v4 }
  0x1b   : > { %s232_s6 = scalar_lea.vmem (!%p224_p7), [#allocation2], %s425_s5 }
  0x1c   : > { %v271_v5 = vld [vmem:[%s232_s6] sm:$0xff] (!%p224_p7)  ;;  %v272_v8 = vld [vmem:[%s232_s6 + $0x8] sm:$0xff] (!%p224_p7)  ;;  %v273_v11 = vld [vmem:[%s232_s6 + $0x10] sm:$0xff] (!%p224_p7) }
  0x1d   : > { %v275_v6 = vunpack.c.l.s8.bf16 (!%p224_p7), %v271_v5  ;;  %v276_v7 = vunpack.c.h.s8.bf16 (!%p224_p7), %v271_v5  ;;  %v277_v9 = vunpack.c.l.s8.bf16 (!%p224_p7), %v272_v8  ;;  %v278_v10 = vunpack.c.h.s8.bf16 (!%p224_p7), %v272_v8  ;;  %v274_v14 = vld [vmem:[%s232_s6 + $0x18] sm:$0xff] (!%p224_p7) }
  0x1e   : > { %v279_v12 = vunpack.c.l.s8.bf16 (!%p224_p7), %v273_v11  ;;  %v280_v13 = vunpack.c.h.s8.bf16 (!%p224_p7), %v273_v11  ;;  %v281_v15 = vunpack.c.l.s8.bf16 (!%p224_p7), %v274_v14  ;;  %v282_v16 = vunpack.c.h.s8.bf16 (!%p224_p7), %v274_v14 }
  0x1f   : > { %441 = vmatpush3.bf16.msra.mxu0 (!%p224_p7), %v275_v6 }
  0x20   : > { %442 = vmatprep.subr.bf16.mxu0 (!%p224_p7), %v510_v4 }
  0x21   : > { %s609_s18 = smov (!%p260_p8, %s418_s18), 3 }
  0x22   : > { %s262_s11 = scalar_lea.vmem %s602_s2, %s609_s18  ;;  %s265_s14 = scalar_lea.vmem %s603_s3, %s609_s18 }
  0x23   : > { %443 = vmatpush3.bf16.msra.mxu0 %v276_v7  ;;  %v427_v18 = vld [vmem:[%s262_s11] ss:$0 sm:$0xff]  ;;  %s426_s15 = sshll.u32 %s609_s18, 3 }
  0x24   : > { %444 = vmatprep.subr.bf16.mxu0 %v510_v4  ;;  %v428_v20 = vld [vmem:[%s265_s14] ss:$0 sm:$0xff]  ;;  %s269_s23 = scalar_lea.vmem %s604_s4, %s426_s15 }
  0x27   : > { %445 = vmatpush3.bf16.msra.mxu0 %v277_v9 }
  0x28   : > { %446 = vmatprep.subr.bf16.mxu0 %v510_v4 }
  0x2b   : > { %447 = vmatpush3.bf16.msra.mxu0 %v278_v10 }
  0x2c   : > { %448 = vmatprep.subr.bf16.mxu0 %v510_v4 }
  0x2f   : > { %449 = vmatpush3.bf16.msra.mxu0 %v279_v12 }
  0x30   : > { %450 = vmatprep.subr.bf16.mxu0 %v510_v4 }
  0x33   : > { %451 = vmatpush3.bf16.msra.mxu0 %v280_v13 }
  0x34   : > { %452 = vmatprep.subr.bf16.mxu0 %v510_v4 }
  0x37   : > { %453 = vmatpush3.bf16.msra.mxu0 %v281_v15 }
  0x38   : > { %454 = vmatprep.subr.bf16.mxu0 %v510_v4 }
  0x3b   : > { %455 = vmatpush3.bf16.msra.mxu0 %v282_v16 }
  0x3e   : > { %457 = vmatmul.mubr.bf16.vlgmr.msra.gmra.mrb[0].mxu0 %v283_v17 }
 0x111   : > { %v318_v19 = vpop.f32.mrb[0].mxu0 }
 0x112   : > { %v331_v21 = vmul.f32 %v427_v18, %v318_v19  ;;  %v458_v22 = vpop.f32.mrb[1].mxu0 }
 0x113   : > { %v321_v23 = vpop.f32.mrb[2].mxu0 }
 0x114   : > { %v339_v24 = vadd.f32 %v428_v20, %v331_v21  ;;  %v459_v25 = vpop.f32.mrb[3].mxu0 }
 0x116   : > { %340 = vst [vmem:[%s269_s23] sm:$0xff] %v339_v24 }
 0x117 PF: > { %p11_p9 = scmp.ge.s32.totalorder %s554_s19, 6   ;;  %s605_s15 = smov %s504_s16 }
 0x118   : > { %s606_s16 = smov %s563_s22  ;;  %s607_s17 = smov %s554_s19 }
 0x119   :  { %13 = sbr.rel (!%p11_p9) target bundleno = 2 (0x2), region = 115 }

// kernel: decoder_forward.2
= control target key start
LH: loop header
LB: loop body
LE: loop exit
PB: predicated region body
PF: predicated region fallthrough
CT: control target
= control target key end

     0   :  { %13 = vsyncpa [#allocation3], 0  ;;  %s968_s0 = inlined_call_operand.vmem [shape: bf16[8,128], index: 0, kind: input, shape index: {}]   ;;  %s969_s1 = inlined_call_operand.vmem [shape: f32[8,128], index: 1, kind: input, shape index: {}]   ;;  %s970_s2 = inlined_call_operand.hbm [shape: bf16[128,384], index: 2, kind: input, shape index: {}]   ;;  %s971_s3 = inlined_call_operand.hbm [shape: bf16[128,384], index: 3, kind: input, shape index: {}]   ;;  %s972_s4 = inlined_call_operand.vmem [shape: f32[1,384], index: 4, kind: input, shape index: {}]   ;;  %s973_s5 = inlined_call_operand.vmem [shape: f32[1,384], index: 5, kind: input, shape index: {}]   ;;  %s974_s6 = inlined_call_operand.vmem [shape: f32[8,128], index: 6, kind: output, shape index: {0}]   ;;  %s975_s7 = inlined_call_operand.vmem [shape: bf16[8,128], index: 7, kind: output, shape index: {1}]  }
   0x1   :  { %14 = vsyncpa [#allocation5], 0  ;;  %s852_s24 = smov [#allocation2]   ;;  %s804_s28 = scalar_lea.hbm %s970_s2, 3072 }
   0x2   :  { %s24_s25 = sshll.u32 %s852_s24, 4  ;;  %p805_p0 = scmp.ne.s32.totalorder %s970_s2, %s804_s28  ;;  %s25_s25 = int_to_ptr.vmem [resolvable:$true] %s24_s25 }
   0x3   :  { %p808_p1 = scmp.lt.u32.totalorder %s804_s28, %s970_s2 }
   0x5   :  { %p810_p2 = pnand %p808_p1, %p805_p0 }
   0x7   :  { %813 = shalt.err (!%p810_p2)
}
   0x8   :  { %s814_s10 = scalar_lea.vmem %s25_s25, 3072  ;;  %p819_p4 = scmp.lt.s32.totalorder %s25_s25, %s25_s25 }
   0x9   :  { %p815_p3 = scmp.ne.s32.totalorder %s25_s25, %s814_s10  ;;  %p820_p5 = scmp.lt.s32.totalorder %s814_s10, %s814_s10 }
   0xb   :  { %p821_p6 = por %p820_p5, %p819_p4 }
   0xd   :  { %p822_p7 = pnand %p821_p6, %p815_p3 }
   0xf   :  { %825 = shalt.err (!%p822_p7)
}
  0x10   :  { %s853_s11 = smov 192   ;;  %s854_s12 = smov 12  }
  0x11   :  { %30 = dma.hbm_to_vmem [thread:$0]  %s970_s2, 3072, %s25_s25, [#allocation3], %s853_s11, %s853_s11, %s854_s12  }
  0x12   :  { %s855_s15 = smov [#allocation4]   ;;  %s826_s19 = scalar_lea.hbm %s971_s3, 3072 }
  0x13   :  { %s36_s16 = sshll.u32 %s855_s15, 4  ;;  %p827_p8 = scmp.ne.s32.totalorder %s971_s3, %s826_s19  ;;  %s37_s16 = int_to_ptr.vmem [resolvable:$true] %s36_s16 }
  0x14   :  { %p830_p9 = scmp.lt.u32.totalorder %s826_s19, %s971_s3 }
  0x16   :  { %p832_p10 = pnand %p830_p9, %p827_p8 }
  0x18   :  { %835 = shalt.err (!%p832_p10)
}
  0x19   :  { %s836_s24 = scalar_lea.vmem %s37_s16, 3072  ;;  %p841_p12 = scmp.lt.s32.totalorder %s37_s16, %s37_s16 }
  0x1a   :  { %p837_p11 = scmp.ne.s32.totalorder %s37_s16, %s836_s24  ;;  %p842_p13 = scmp.lt.s32.totalorder %s836_s24, %s836_s24 }
  0x1c   :  { %p843_p0 = por %p842_p13, %p841_p12 }
  0x1e   :  { %p844_p1 = pnand %p843_p0, %p837_p11 }
  0x20   :  { %847 = shalt.err (!%p844_p1)
}
  0x21   :  { %42 = dma.hbm_to_vmem [thread:$0]  %s971_s3, 3072, %s37_s16, [#allocation5], %s853_s11, %s853_s11, %s854_s12  }
  0x22   :  { %848 = dma.done.wait [#allocation3], 3072  }
  0x23   :  { %849 = vsyncadd [#allocation3], 4294964224 }
  0x24   :  { %850 = dma.done.wait [#allocation5], 3072  }
  0x25   :  { %851 = vsyncadd [#allocation5], 4294964224  ;;  %v856_v0 = vmov 0.0   ;;  %v857_v1 = vmov 0   ;;  %vm858_vm0 = vmmov 0   ;;  %v948_v48 = vld [vmem:[%s969_s1] sm:$0xff]  ;;  %v90_v57 = vlaneseq }
  0x26   :  { %675 = vmatprep.subr.bf16.mxu1 %v856_v0  ;;  %265 = vmatprep.mubr.bf16.mxu0 %v857_v1  ;;  %v730_v2 = vld [vmem:[#allocation2 + $0x4] ss:$12 sps:$4 sm:$0xff]   ;;  %v732_v3 = vld [vmem:[#allocation2] ss:$12 sps:$4 sm:$0xff]   ;;  %v733_v4 = vld [vmem:[#allocation2 + $0x1c] ss:$12 sps:$4 sm:$0xff]   ;;  %v314_v50 = vpack.c.bf16 %v948_v48, %v948_v48 }
  0x27   :  { %691 = vmatprep.mubr.msk.bf16.mxu1 %vm858_vm0, %v856_v0  ;;  %233 = vmatprep.subr.bf16.mxu0 %v730_v2  ;;  %v735_v5 = vld [vmem:[#allocation2 + $0x18] ss:$12 sps:$4 sm:$0xff]   ;;  %v736_v6 = vld [vmem:[#allocation2 + $0x34] ss:$12 sps:$4 sm:$0xff]   ;;  %v738_v7 = vld [vmem:[#allocation2 + $0x30] ss:$12 sps:$4 sm:$0xff]  }
  0x28   :  { %234 = vmatpush1.bf16.msra.mxu0 %v732_v3  ;;  %v739_v8 = vld [vmem:[#allocation2 + $0x4c] ss:$12 sps:$4 sm:$0xff]   ;;  %v750_v9 = vld [vmem:[#allocation2 + $0x8] ss:$12 sps:$4 sm:$0xff]   ;;  %v742_v11 = vld [vmem:[#allocation2 + $0x64] ss:$12 sps:$4 sm:$0xff]  }
  0x29   :  { %235 = vmatprep.subr.bf16.mxu0 %v733_v4  ;;  %v741_v10 = vld [vmem:[#allocation2 + $0x48] ss:$12 sps:$4 sm:$0xff]   ;;  %676 = vmatpush3.bf16.msra.mxu1 %v750_v9  ;;  %v754_v12 = vld [vmem:[#allocation2 + $0x20] ss:$12 sps:$4 sm:$0xff]   ;;  %v756_v14 = vld [vmem:[#allocation2 + $0x38] ss:$12 sps:$4 sm:$0xff]  }
  0x2a   :  { %677 = vmatprep.subr.bf16.mxu1 %v856_v0  ;;  %v744_v13 = vld [vmem:[#allocation2 + $0x60] ss:$12 sps:$4 sm:$0xff]   ;;  %v745_v15 = vld [vmem:[#allocation2 + $0x7c] ss:$12 sps:$4 sm:$0xff]   ;;  %v747_v16 = vld [vmem:[#allocation2 + $0x78] ss:$12 sps:$4 sm:$0xff]  }
  0x2b   :  { %v760_v17 = vld [vmem:[#allocation2 + $0x50] ss:$12 sps:$4 sm:$0xff]   ;;  %v748_v18 = vld [vmem:[#allocation2 + $0x94] ss:$12 sps:$4 sm:$0xff]   ;;  %v752_v21 = vld [vmem:[#allocation2 + $0xac] ss:$12 sps:$4 sm:$0xff]  }
  0x2c   :  { %236 = vmatpush1.bf16.msra.mxu0 %v735_v5  ;;  %v751_v19 = vld [vmem:[#allocation2 + $0x90] ss:$12 sps:$4 sm:$0xff]   ;;  %v764_v20 = vld [vmem:[#allocation2 + $0x68] ss:$12 sps:$4 sm:$0xff]   ;;  %v768_v23 = vld [vmem:[#allocation2 + $0x80] ss:$12 sps:$4 sm:$0xff]  }
  0x2d   :  { %237 = vmatprep.subr.bf16.mxu0 %v736_v6  ;;  %678 = vmatpush3.bf16.msra.mxu1 %v754_v12  ;;  %v755_v22 = vld [vmem:[#allocation2 + $0xa8] ss:$12 sps:$4 sm:$0xff]   ;;  %v759_v24 = vld [vmem:[#allocation4 + $0x4] ss:$12 sps:$4 sm:$0xff]   ;;  %v757_v25 = vld [vmem:[#allocation4] ss:$12 sps:$4 sm:$0xff]  }
  0x2e   :  { %679 = vmatprep.subr.bf16.mxu1 %v856_v0  ;;  %v54_v26 = vld [vmem:[%s968_s0] sm:$0xf]  ;;  %v772_v27 = vld [vmem:[#allocation2 + $0x98] ss:$12 sps:$4 sm:$0xff]   ;;  %v763_v28 = vld [vmem:[#allocation4 + $0x1c] ss:$12 sps:$4 sm:$0xff]  }
  0x2f   :  { %v761_v29 = vld [vmem:[#allocation4 + $0x18] ss:$12 sps:$4 sm:$0xff]   ;;  %v776_v30 = vld [vmem:[#allocation2 + $0xb0] ss:$12 sps:$4 sm:$0xff]   ;;  %v767_v31 = vld [vmem:[#allocation4 + $0x34] ss:$12 sps:$4 sm:$0xff]  }
  0x30   :  { %238 = vmatpush1.bf16.msra.mxu0 %v738_v7  ;;  %v765_v32 = vld [vmem:[#allocation4 + $0x30] ss:$12 sps:$4 sm:$0xff]   ;;  %v783_v33 = vld [vmem:[#allocation4 + $0x8] ss:$12 sps:$4 sm:$0xff]   ;;  %v771_v34 = vld [vmem:[#allocation4 + $0x4c] ss:$12 sps:$4 sm:$0xff]  }
  0x31   :  { %239 = vmatprep.subr.bf16.mxu0 %v739_v8  ;;  %680 = vmatpush3.bf16.msra.mxu1 %v756_v14  ;;  %v769_v35 = vld [vmem:[#allocation4 + $0x48] ss:$12 sps:$4 sm:$0xff]   ;;  %v787_v36 = vld [vmem:[#allocation4 + $0x20] ss:$12 sps:$4 sm:$0xff]   ;;  %v775_v37 = vld [vmem:[#allocation4 + $0x64] ss:$12 sps:$4 sm:$0xff]  }
  0x32   :  { %681 = vmatprep.subr.bf16.mxu1 %v856_v0  ;;  %v773_v38 = vld [vmem:[#allocation4 + $0x60] ss:$12 sps:$4 sm:$0xff]   ;;  %v788_v39 = vld [vmem:[#allocation4 + $0x38] ss:$12 sps:$4 sm:$0xff]   ;;  %v779_v40 = vld [vmem:[#allocation4 + $0x7c] ss:$12 sps:$4 sm:$0xff]  }
  0x33   :  { %v777_v41 = vld [vmem:[#allocation4 + $0x78] ss:$12 sps:$4 sm:$0xff]   ;;  %v789_v42 = vld [vmem:[#allocation4 + $0x50] ss:$12 sps:$4 sm:$0xff]   ;;  %v782_v43 = vld [vmem:[#allocation4 + $0x94] ss:$12 sps:$4 sm:$0xff]  }
  0x34   :  { %240 = vmatpush1.bf16.msra.mxu0 %v741_v10  ;;  %v780_v44 = vld [vmem:[#allocation4 + $0x90] ss:$12 sps:$4 sm:$0xff]   ;;  %v790_v45 = vld [vmem:[#allocation4 + $0x68] ss:$12 sps:$4 sm:$0xff]   ;;  %v786_v46 = vld [vmem:[#allocation4 + $0xac] ss:$12 sps:$4 sm:$0xff]  }
  0x35   :  { %241 = vmatprep.subr.bf16.mxu0 %v742_v11  ;;  %682 = vmatpush3.bf16.msra.mxu1 %v760_v17  ;;  %v784_v47 = vld [vmem:[#allocation4 + $0xa8] ss:$12 sps:$4 sm:$0xff]   ;;  %v791_v49 = vld [vmem:[#allocation4 + $0x80] ss:$12 sps:$4 sm:$0xff]   ;;  %v792_v51 = vld [vmem:[#allocation4 + $0x98] ss:$12 sps:$4 sm:$0xff]  }
  0x36   :  { %683 = vmatprep.subr.bf16.mxu1 %v856_v0  ;;  %v793_v52 = vld [vmem:[#allocation4 + $0xb0] ss:$12 sps:$4 sm:$0xff]   ;;  %v91_v58 = vshrl.u32 %v90_v57, 7  ;;  %v347_v60 = vld [vmem:[%s973_s5] sm:$0x7] }
  0x37   :  { %v88_v61 = vld [vmem:[%s972_s4] sm:$0x7] }
  0x38   :  { %242 = vmatpush1.bf16.msra.mxu0 %v744_v13  ;;  %v92_v59 = vsub.s32 0, %v91_v58  ;;  %v96_v62 = vsub.s32 1, %v91_v58 }
  0x39   :  { %243 = vmatprep.subr.bf16.mxu0 %v745_v15  ;;  %684 = vmatpush3.bf16.msra.mxu1 %v764_v20 }
  0x3a   :  { %685 = vmatprep.subr.bf16.mxu1 %v856_v0  ;;  %v93_v63 = vrot.slane %v88_v61, %v92_v59  ;;  %v356_v2 = vrot.slane %v347_v60, %v96_v62 }
  0x3c   :  { %244 = vmatpush1.bf16.msra.mxu0 %v747_v16 }
  0x3d   :  { %245 = vmatprep.subr.bf16.mxu0 %v748_v18  ;;  %686 = vmatpush3.bf16.msra.mxu1 %v768_v23 }
  0x3e   :  { %687 = vmatprep.subr.bf16.mxu1 %v856_v0 }
  0x40   :  { %246 = vmatpush1.bf16.msra.mxu0 %v751_v19  ;;  %v100_v19 = vsub.s32 2, %v91_v58 }
  0x41   :  { %247 = vmatprep.subr.bf16.mxu0 %v752_v21  ;;  %688 = vmatpush3.bf16.msra.mxu1 %v772_v27 }
  0x42   :  { %689 = vmatprep.subr.bf16.mxu1 %v856_v0  ;;  %v360_v20 = vrot.slane %v347_v60, %v100_v19 }
  0x44   :  { %248 = vmatpush1.bf16.msra.mxu0 %v755_v22  ;;  %v101_v22 = vrot.slane %v88_v61, %v100_v19 }
  0x45   :  { %492 = vmatprep.subr.bf16.mxu0 %v759_v24  ;;  %690 = vmatpush3.bf16.msra.mxu1 %v776_v30 }
  0x46   :  { %695 = vmatprep.subr.bf16.mxu1 %v856_v0 }
  0x47   :  { %266 = vmatmul.mubr.bf16.vlgmr.msra.gmra.mrb[0].mxu0 %v54_v26 }
  0x48   :  { %493 = vmatpush1.bf16.msra.mxu0 %v757_v25  ;;  %524 = vmatprep.mubr.bf16.mxu0 %v857_v1  ;;  %v97_v1 = vrot.slane %v88_v61, %v96_v62 }
  0x49   :  { %494 = vmatprep.subr.bf16.mxu0 %v763_v28  ;;  %692 = vmatmul.mubr.bf16.vlgmr.msra.gmra.mrb[0].mxu1 %v54_v26 }
  0x4a   :  { %696 = vmatpush3.bf16.msra.mxu1 %v783_v33  ;;  %711 = vmatprep.mubr.msk.bf16.mxu1 %vm858_vm0, %v856_v0  ;;  %v717_v5 = vadd.f32 %v356_v2, %v97_v1 }
  0x4b   :  { %697 = vmatprep.subr.bf16.mxu1 %v856_v0 }
  0x4c   :  { %495 = vmatpush1.bf16.msra.mxu0 %v761_v29 }
  0x4d   :  { %496 = vmatprep.subr.bf16.mxu0 %v767_v31 }
  0x4e   :  { %698 = vmatpush3.bf16.msra.mxu1 %v787_v36 }
  0x4f   :  { %699 = vmatprep.subr.bf16.mxu1 %v856_v0 }
  0x50   :  { %497 = vmatpush1.bf16.msra.mxu0 %v765_v32 }
  0x51   :  { %498 = vmatprep.subr.bf16.mxu0 %v771_v34 }
  0x52   :  { %700 = vmatpush3.bf16.msra.mxu1 %v788_v39 }
  0x53   :  { %701 = vmatprep.subr.bf16.mxu1 %v856_v0 }
  0x54   :  { %499 = vmatpush1.bf16.msra.mxu0 %v769_v35 }
  0x55   :  { %500 = vmatprep.subr.bf16.mxu0 %v775_v37 }
  0x56   :  { %702 = vmatpush3.bf16.msra.mxu1 %v789_v42 }
  0x57   :  { %703 = vmatprep.subr.bf16.mxu1 %v856_v0 }
  0x58   :  { %501 = vmatpush1.bf16.msra.mxu0 %v773_v38 }
  0x59   :  { %502 = vmatprep.subr.bf16.mxu0 %v779_v40 }
  0x5a   :  { %704 = vmatpush3.bf16.msra.mxu1 %v790_v45 }
  0x5b   :  { %705 = vmatprep.subr.bf16.mxu1 %v856_v0 }
  0x5c   :  { %503 = vmatpush1.bf16.msra.mxu0 %v777_v41 }
  0x5d   :  { %504 = vmatprep.subr.bf16.mxu0 %v782_v43 }
  0x5e   :  { %706 = vmatpush3.bf16.msra.mxu1 %v791_v49 }
  0x5f   :  { %707 = vmatprep.subr.bf16.mxu1 %v856_v0 }
  0x60   :  { %505 = vmatpush1.bf16.msra.mxu0 %v780_v44 }
  0x61   :  { %506 = vmatprep.subr.bf16.mxu0 %v786_v46 }
  0x62   :  { %708 = vmatpush3.bf16.msra.mxu1 %v792_v51 }
  0x63   :  { %709 = vmatprep.subr.bf16.mxu1 %v856_v0  ;;  %v352_v0 = vrot.slane %v347_v60, %v92_v59 }
  0x64   :  { %507 = vmatpush1.bf16.msra.mxu0 %v784_v47 }
  0x65   :  { %v715_v3 = vadd.f32 %v352_v0, %v93_v63 }
  0x66   :  { %710 = vmatpush3.bf16.msra.mxu1 %v793_v52 }
  0x67   :  { %525 = vmatmul.mubr.bf16.vlgmr.msra.gmra.mrb[0].mxu0 %v314_v50 }
  0x69   :  { %712 = vmatmul.mubr.bf16.vlgmr.msra.gmra.mrb[4].mxu1 %v314_v50 }
 0x11c   :  { %v308_v53 = vpop.f32.mrb[0].mxu1 }
 0x11d   :  { %v693_v54 = vpop.f32.mrb[1].mxu1  ;;  %v309_v26 = vadd.f32 %v308_v53, %v101_v22 }
 0x11e   :  { %v311_v55 = vpop.f32.mrb[2].mxu1 }
 0x11f   :  { %v694_v56 = vpop.f32.mrb[3].mxu1 }
 0x13a   :  { %v526_v4 = vpop.f32.mrb[0].mxu0 }
 0x13b   :  { %v716_v6 = vadd.f32 %v715_v3, %v526_v4  ;;  %v528_v7 = vpop.f32.mrb[1].mxu0 }
 0x13c   :  { %v530_v8 = vpop.f32.mrb[2].mxu0  ;;  %v718_v11 = vadd.f32 %v717_v5, %v528_v7  ;;  %v567_v13 = vpop.f32.mrb[4].mxu1 }
 0x13d   :  { %v655_v9 = vmul.f32 -1.442695, %v716_v6  ;;  %v531_v10 = vpop.f32.mrb[3].mxu0  ;;  %v713_v14 = vpop.f32.mrb[5].mxu1  ;;  %v568_v24 = vadd.f32 %v567_v13, %v360_v20 }
 0x13e   :  { %v656_v12 = vmul.f32 -1.442695, %v718_v11  ;;  %v570_v15 = vpop.f32.mrb[6].mxu1 }
 0x13f   :  { %794 = vpow2.f32 %v655_v9  ;;  %v714_v16 = vpop.f32.mrb[7].mxu1 }
 0x140   :  { %796 = vpow2.f32 %v656_v12 }
 0x149   :  { %v795_v17 = vpop.eup %794 }
 0x14a   :  { %v577_v18 = vadd.f32 1.0, %v795_v17  ;;  %v797_v21 = vpop.eup %796 }
 0x14b   :  { %v584_v23 = vadd.f32 1.0, %v797_v21 }
 0x14c   :  { %798 = vrcp.f32 %v577_v18 }
 0x14d   :  { %800 = vrcp.f32 %v584_v23 }
 0x156   :  { %v799_v25 = vpop.eup %798 }
 0x157   :  { %v587_v27 = vmul.f32 %v799_v25, %v568_v24  ;;  %v801_v29 = vpop.eup %800 }
 0x158   :  { %v590_v30 = vsub.f32 1.0, %v801_v29  ;;  %v592_v32 = vmul.f32 %v801_v29, %v948_v48 }
 0x159   :  { %v588_v28 = vadd.f32 %v587_v27, %v309_v26 }
 0x15b   :  { %802 = vtanh.f32 %v588_v28 }
 0x165   :  { %v803_v31 = vpop.eup %802 }
 0x166   :  { %v591_v33 = vmul.f32 %v803_v31, %v590_v30 }
 0x168   :  { %v593_v34 = vadd.f32 %v592_v32, %v591_v33 }
 0x16a   :  { %594 = vst [vmem:[%s974_s6] sm:$0xff] %v593_v34  ;;  %v595_v35 = vpack.c.bf16 %v593_v34, %v593_v34 }
 0x16c   :  { %596 = vst [vmem:[%s975_s7] sm:$0xf] %v595_v35 }
 0x16d   :  { %605 = vsyncpa [#allocation3], 1 }
 0x16e   :  { %606 = vsyncpa [#allocation5], 1 }

</bundles_post_ra>
